<compile_context>
chip_gen: v5e
topology: v5e:2x2
jax: 0.10.0
libtpu: 0.0.40
codegen_flags: <defaults>
</compile_context>

<pallas_src>
import jax
import jax.numpy as jnp
from jax import lax
from jax.experimental import pallas as pl
from jax.experimental.pallas import tpu as pltpu


def fm_kernel(x_ref, vw_ref, v2_ref, b_ref, out_ref):
    x = x_ref[...]                                    # (bn, in_dim), batch on sublanes

    # One MXU pass for ip1 and the linear term: vw = [v^T ; w_row]  -> (k+1, bn)
    # (contract on in_dim of both operands so the batch stays on lanes).
    t = lax.dot_general(vw_ref[...], x, (((1,), (1,)), ((), ())),
                        preferred_element_type=jnp.float32)          # (k+1, bn)

    # Second MXU pass: (x^2) @ (v^2)  transposed -> (k, bn).  v^2 is precomputed.
    t2 = lax.dot_general(v2_ref[...], x * x, (((1,), (1,)), ((), ())),
                         preferred_element_type=jnp.float32)         # (k, bn)

    ip1 = t[:-1, :]                                   # (k, bn)  rows 0..k-1 = x @ v
    lin = t[-1:, :] + b_ref[...]                      # (1, bn)  last row = w.x (+ bias)

    pair = jnp.sum(ip1 * ip1 - t2, axis=0, keepdims=True)            # (1, bn)
    out_ref[...] = lin + 0.5 * pair                   # lane-dense (1, bn) store


def _choose_block_n(n, in_dim, *, target=4096, tile_vmem_budget=12 * 1024 * 1024):
    """Largest lane-width that fits a double-buffered f32 x-tile in the budget,
    keeping >= 2 grid steps (v7x megacore) when the batch allows it."""
    n128 = -(-n // 128) * 128
    cap = max(128, (tile_vmem_budget // (2 * in_dim * 4)) // 128 * 128)
    bn = min(target, cap, n128)
    if n128 >= 256:  # keep at least 2 grid steps so "parallel" can split across TCs
        bn = min(bn, max(128, ((n128 // 2) // 128) * 128))
    return bn


def factorization_machine(x, weight, bias, v, *, block_n=None):
    """x: (N, in_dim); weight: (1, in_dim); bias: (1,); v: (in_dim, k) -> (N, 1)."""
    N, in_dim = x.shape
    k = v.shape[1]

    bn = block_n if block_n is not None else _choose_block_n(N, in_dim)
    num_tiles = -(-N // bn)
    n_pad = num_tiles * bn

    # Tiny wrapper-side parameter prep (k x in_dim sized, negligible traffic):
    vt = v.T.astype(jnp.float32)                                    # (k, in_dim)
    vw = jnp.concatenate([vt, weight.reshape(1, in_dim).astype(jnp.float32)],
                         axis=0)                                    # (k+1, in_dim)
    v2t = vt * vt                                                   # (k, in_dim)
    b2 = bias.reshape(1, 1).astype(jnp.float32)                     # (1, 1)

    out = pl.pallas_call(
        fm_kernel,
        out_shape=jax.ShapeDtypeStruct((1, n_pad), jnp.float32),
        grid_spec=pltpu.PrefetchScalarGridSpec(
            num_scalar_prefetch=0,
            grid=(num_tiles,),
            in_specs=[
                pl.BlockSpec((bn, in_dim), lambda i: (i, 0)),        # x batch tile
                pl.BlockSpec((k + 1, in_dim), lambda i: (0, 0)),     # [v^T ; w]
                pl.BlockSpec((k, in_dim), lambda i: (0, 0)),         # (v^2)^T
                pl.BlockSpec((1, 1), lambda i: (0, 0)),              # bias
            ],
            out_specs=pl.BlockSpec((1, bn), lambda i: (0, i)),
        ),
        compiler_params=pltpu.CompilerParams(
            dimension_semantics=("parallel",),
            vmem_limit_bytes=32 * 1024 * 1024),
    )(x, vw, v2t, b2)

    # Padded lanes (if any) carry garbage from the ragged edge block; strip them.
    return out[0, :N].reshape(N, 1)


if __name__ == "__main__":
    N, in_dim, k = 256, 32, 8

    key = jax.random.PRNGKey(0)
    kx, kw, kb, kv = jax.random.split(key, 4)

    x = jax.random.normal(kx, (N, in_dim), dtype=jnp.float32)
    weight = jax.random.normal(kw, (1, in_dim), dtype=jnp.float32) * (1.0 / jnp.sqrt(in_dim))
    bias = jax.random.normal(kb, (1,), dtype=jnp.float32) * 0.1
    # module inits v to zeros; use random values so the pairwise term is exercised
    v = jax.random.normal(kv, (in_dim, k), dtype=jnp.float32) * (1.0 / jnp.sqrt(in_dim))

    out = factorization_machine(x, weight, bias, v)
    out = jax.block_until_ready(out)

    # pure-JAX reference mirroring the PyTorch forward
    lin = x @ weight.T + bias                     # (N, 1)
    ip1 = x @ v                                   # (N, k)
    ip2 = (x * x) @ (v * v)                       # (N, k)
    pair = jnp.sum(ip1 * ip1 - ip2, axis=1)       # (N,)
    ref = (lin.T + 0.5 * pair).reshape(-1, 1)     # (N, 1)

    assert out.shape == (N, 1)
    assert bool(jnp.allclose(out, ref, rtol=1e-3, atol=1e-3))
    print("KERNEL_OK")
</pallas_src>

<mosaic_0001>
module attributes {stable_mosaic.version = 11 : i64} {
  func.func @fm_kernel(%arg0: i32, %arg1: memref<128x32xf32, #tpu.memory_space<vmem>>, %arg2: memref<9x32xf32, #tpu.memory_space<vmem>>, %arg3: memref<8x32xf32, #tpu.memory_space<vmem>>, %arg4: memref<1x1xf32, #tpu.memory_space<vmem>>, %arg5: memref<1x128xf32, #tpu.memory_space<vmem>>) attributes {dimension_semantics = [#tpu.dimension_semantics<parallel>], iteration_bounds = array<i64: 2>, scalar_prefetch = 0 : i64, scratch_operands = 0 : i64, tpu.core_type = #tpu.core_type<tc>, window_params = [{transform_indices = @transform_0, window_bounds = array<i64: 128, 32>}, {pipeline_mode = #tpu.pipeline_mode<synchronous>, transform_indices = @transform_1, window_bounds = array<i64: 9, 32>}, {pipeline_mode = #tpu.pipeline_mode<synchronous>, transform_indices = @transform_2, window_bounds = array<i64: 8, 32>}, {pipeline_mode = #tpu.pipeline_mode<synchronous>, transform_indices = @transform_3, window_bounds = array<i64: 1, 1>}, {transform_indices = @transform_4, window_bounds = array<i64: 1, 128>}]} {
    %c0 = arith.constant 0 : index
    %c0_0 = arith.constant 0 : index
    %0 = vector.load %arg1[%c0, %c0_0] : memref<128x32xf32, #tpu.memory_space<vmem>>, vector<128x32xf32>
    %c0_1 = arith.constant 0 : index
    %c0_2 = arith.constant 0 : index
    %1 = vector.load %arg2[%c0_1, %c0_2] : memref<9x32xf32, #tpu.memory_space<vmem>>, vector<9x32xf32>
    %cst = arith.constant dense<0.000000e+00> : vector<9x128xf32>
    %2 = tpu.matmul %1, %0, %cst {dimension_numbers = #tpu.dot_dimension_numbers<[1], [1], [0], [0], [0, 0, 1, 0], [], []>} : vector<9x32xf32>, vector<128x32xf32>, vector<9x128xf32> -> vector<9x128xf32>
    %c0_3 = arith.constant 0 : index
    %c0_4 = arith.constant 0 : index
    %3 = vector.load %arg3[%c0_3, %c0_4] : memref<8x32xf32, #tpu.memory_space<vmem>>, vector<8x32xf32>
    %4 = arith.mulf %0, %0 : vector<128x32xf32>
    %cst_5 = arith.constant dense<0.000000e+00> : vector<8x128xf32>
    %5 = tpu.matmul %3, %4, %cst_5 {dimension_numbers = #tpu.dot_dimension_numbers<[1], [1], [0], [0], [0, 0, 1, 0], [], []>} : vector<8x32xf32>, vector<128x32xf32>, vector<8x128xf32> -> vector<8x128xf32>
    %6 = vector.extract_strided_slice %2 {offsets = [0, 0], sizes = [8, 128], strides = [1, 1]} : vector<9x128xf32> to vector<8x128xf32>
    %7 = vector.extract_strided_slice %2 {offsets = [8, 0], sizes = [1, 128], strides = [1, 1]} : vector<9x128xf32> to vector<1x128xf32>
    %c0_6 = arith.constant 0 : index
    %c0_7 = arith.constant 0 : index
    %8 = vector.load %arg4[%c0_6, %c0_7] : memref<1x1xf32, #tpu.memory_space<vmem>>, vector<1x1xf32>
    %9 = vector.broadcast %8 : vector<1x1xf32> to vector<1x128xf32>
    %10 = arith.addf %7, %9 : vector<1x128xf32>
    %11 = arith.mulf %6, %6 : vector<8x128xf32>
    %12 = arith.subf %11, %5 : vector<8x128xf32>
    %cst_8 = arith.constant dense<0.000000e+00> : vector<128xf32>
    %13 = vector.multi_reduction <add>, %12, %cst_8 [0] : vector<8x128xf32> to vector<128xf32>
    %14 = vector.shape_cast %13 : vector<128xf32> to vector<1x128xf32>
    %cst_9 = arith.constant 5.000000e-01 : f32
    %15 = vector.broadcast %cst_9 : f32 to vector<1x128xf32>
    %16 = arith.mulf %15, %14 : vector<1x128xf32>
    %17 = arith.addf %10, %16 : vector<1x128xf32>
    %c0_10 = arith.constant 0 : index
    %c0_11 = arith.constant 0 : index
    %18 = vector.load %arg5[%c0_10, %c0_11] : memref<1x128xf32, #tpu.memory_space<vmem>>, vector<1x128xf32>
    tpu.vector_store %arg5[%c0_10, %c0_11], %17 {strides = array<i32>} : memref<1x128xf32, #tpu.memory_space<vmem>>, vector<1x128xf32>,
    return
  }
  func.func @transform_0(%arg0: i32) -> (i32, i32) {
    %c0_i32 = arith.constant 0 : i32
    %c0_i32_0 = arith.constant 0 : i32
    return %arg0, %c0_i32 : i32, i32
  }
  func.func @transform_1(%arg0: i32) -> (i32, i32) {
    %c0_i32 = arith.constant 0 : i32
    %c0_i32_0 = arith.constant 0 : i32
    %c0_i32_1 = arith.constant 0 : i32
    return %c0_i32, %c0_i32_0 : i32, i32
  }
  func.func @transform_2(%arg0: i32) -> (i32, i32) {
    %c0_i32 = arith.constant 0 : i32
    %c0_i32_0 = arith.constant 0 : i32
    %c0_i32_1 = arith.constant 0 : i32
    return %c0_i32, %c0_i32_0 : i32, i32
  }
  func.func @transform_3(%arg0: i32) -> (i32, i32) {
    %c0_i32 = arith.constant 0 : i32
    %c0_i32_0 = arith.constant 0 : i32
    %c0_i32_1 = arith.constant 0 : i32
    return %c0_i32, %c0_i32_0 : i32, i32
  }
  func.func @transform_4(%arg0: i32) -> (i32, i32) {
    %c0_i32 = arith.constant 0 : i32
    %c0_i32_0 = arith.constant 0 : i32
    return %c0_i32, %arg0 : i32, i32
  }
}

</mosaic_0001>

<bundles_post_ra>
// kernel: tpu_custom_call.1
= control target key start
LH: loop header
LB: loop body
LE: loop exit
PB: predicated region body
PF: predicated region fallthrough
CT: control target
= control target key end

     0   :  { %s825_s0 = inlined_call_operand.vmem [shape: f32[256,32], index: 0, kind: input, shape index: {}]   ;;  %s826_s1 = inlined_call_operand.vmem [shape: f32[9,32], index: 1, kind: input, shape index: {}]   ;;  %s827_s2 = inlined_call_operand.vmem [shape: f32[8,32], index: 2, kind: input, shape index: {}]   ;;  %s828_s3 = inlined_call_operand.<no memory space> [shape: f32[1,1], index: 3, kind: input, shape index: {}]   ;;  %s829_s4 = inlined_call_operand.hbm [shape: f32[1,256], index: 4, kind: output, shape index: {}]  }
   0x1   :  { %v9_v0 = vstv %s828_s3 }
   0x2   :  { %10 = vst [vmem:[#allocation2] sm:$0x1] %v9_v0 }
   0x3   :  { %11 = vsyncpa [#allocation4], 0 }
   0x4   :  { %13 = vsyncpa [#allocation4 + $0x1], 0  ;;  %s663_s17 = smov 0   ;;  %s665_s18 = smov 0  }
   0x5   :  { %s667_s19 = smov 0   ;;  %s669_s20 = smov 0  }
   0x6 LB: > { %s684_s3 = sadd.s32 4294967295, %s632_s20   ;;  %s470_s21 = sadd.s32 4294967294, %s632_s20   ;;  %s632_s20 = sphi %s669_s20, %s835_s20   ;;  %s628_s19 = sphi %s667_s19, %s834_s19   ;;  %s624_s18 = sphi %s665_s18, %s833_s18   ;;  %s620_s17 = sphi %s663_s17, %s832_s17  }
   0x7   : > { %s688_s22 = sadd.s32 1, %s632_s20   ;;  %s115_s23 = sadd.s32 1, %s628_s19 }
   0x8   : > { %s112_s24 = ssub.s32 %s632_s20, %s688_s22  ;;  %p125_p0 = scmp.ne.s32.totalorder %s628_s19, %s624_s18 }
   0x9   : > { %p113_p1 = scmp.eq.s32.totalorder %s112_s24, 0  ;;  %p126_p2 = scmp.eq.s32.totalorder %s684_s3, 1 }
   0xa   : > { %p131_p3 = scmp.ne.s32.totalorder %s624_s18, %s620_s17  ;;  %p132_p4 = scmp.eq.s32.totalorder %s470_s21, 1 }
   0xb   : > { %s699_s25 = scalar_select %p113_p1, %s628_s19, %s115_s23  }
   0xc   : > { %p701_p5 = por %p126_p2, %p125_p0  ;;  %p705_p6 = por %p132_p4, %p131_p3 }
   0xd   : > { %p473_p7 = scmp.ge.s32.totalorder %s632_s20, 1  ;;  %p168_p8 = scmp.lt.s32.totalorder %s632_s20, 3 }
   0xf   : > { %p169_p9 = pnand %p473_p7, %p168_p8 }
  0x10   : > { %s474_s28 = sshll.u32 (!%p169_p9), %s684_s3, 4  ;;  %s191_s13 = sand.u32 (!%p169_p9), 1, %s624_s18  }
  0x11   : > { %172 = sbr.rel (%p169_p9) target bundleno = 238 (0xee), region = 36  ;;  %p194_p10 = scmp.lt.s32.totalorder (!%p169_p9), %s474_s28, 31 }
  0x12   : > { %s411_s16 = scalar_lea.hbm (!%p169_p9), %s829_s4, %s684_s3  ;;  %s192_s21 = scalar_lea.vmem (!%p169_p9), [#allocation3], %s191_s13 }
  0x13   : > { %s413_s23 = sshll.u32 (!%p169_p9), %s192_s21, 4  ;;  %s415_s24 = sshll.u32 (!%p169_p9), %s411_s16, 4  ;;  %s414_s23 = int_to_ptr.vmem [resolvable:$true] %s413_s23  ;;  %s416_s24 = int_to_ptr.hbm [resolvable:$true] %s415_s24 }
  0x16   : > { %s837_s28 = smov (!%p194_p10, %s474_s28), 31  ;;  %vm217_vm0 = vcmask 261120   ;;  %v383_v20 = vld [vmem:[#allocation2] sm:$0x1]  ;;  %v634_v22 = vmov 0  }
  0x17   : > { %s475_s29 = sshll.u32 %s837_s28, 3  ;;  %569 = vset.pattern.permute.xlu0 %v634_v22  ;;  %v215_v35 = vld [vmem:[%s826_s1] sm:$0xff]  ;;  %v216_v36 = vld [vmem:[%s826_s1 + $0x8] sm:$0x1]  ;;  %s403_s28 = scalar_lea.sflag [#allocation4], %s191_s13 }
  0x18   : > { %s715_s6 = scalar_lea.vmem %s825_s0, %s475_s29  ;;  %386 = vperm.xlu0 %569, %v383_v20   ;;  %v295_v37 = vld [vmem:[%s827_s2] sm:$0xff]  ;;  %s584_s29 = sshra.s32 %s416_s24, 4  ;;  %s585_s29 = int_to_ptr.hbm [resolvable:$true] %s584_s29 }
  0x19   : > { %v214_v1 = vld [vmem:[%s715_s6 + $0x78] sm:$0xff]  ;;  %v213_v2 = vld [vmem:[%s715_s6 + $0x70] sm:$0xff]  ;;  %v212_v5 = vld [vmem:[%s715_s6 + $0x68] sm:$0xff]  ;;  %s586_s30 = scalar_lea.hbm %s585_s29, 1  ;;  %p591_p0 = scmp.lt.s32.totalorder %s585_s29, %s829_s4 }
  0x1a   : > { %476 = vmatpush.xpose.msk.msra.mxu0 %vm217_vm0, %v214_v1  ;;  %v311_v3 = vmul.f32 %v214_v1, %v214_v1  ;;  %513 = vmatpush.xpose.msk.msra.mxu2 %vm217_vm0, %v214_v1  ;;  %v310_v4 = vmul.f32 %v213_v2, %v213_v2  ;;  %v309_v6 = vmul.f32 %v212_v5, %v212_v5  ;;  %v211_v7 = vld [vmem:[%s715_s6 + $0x60] sm:$0xff]  ;;  %v210_v9 = vld [vmem:[%s715_s6 + $0x58] sm:$0xff]  ;;  %v209_v11 = vld [vmem:[%s715_s6 + $0x50] sm:$0xff]  ;;  %p587_p11 = scmp.ne.s32.totalorder %s585_s29, %s586_s30 }
  0x1b   : > { %v308_v8 = vmul.f32 %v211_v7, %v211_v7  ;;  %v307_v10 = vmul.f32 %v210_v9, %v210_v9  ;;  %v306_v12 = vmul.f32 %v209_v11, %v209_v11  ;;  %v208_v13 = vld [vmem:[%s715_s6 + $0x48] sm:$0xff]  ;;  %v207_v15 = vld [vmem:[%s715_s6 + $0x40] sm:$0xff]  ;;  %v206_v17 = vld [vmem:[%s715_s6 + $0x38] sm:$0xff] }
  0x1c   : > { %494 = vmatpush.xpose.msk.msra.mxu1 %vm217_vm0, %v311_v3  ;;  %v305_v14 = vmul.f32 %v208_v13, %v208_v13  ;;  %v304_v16 = vmul.f32 %v207_v15, %v207_v15  ;;  %v303_v18 = vmul.f32 %v206_v17, %v206_v17  ;;  %v205_v19 = vld [vmem:[%s715_s6 + $0x30] sm:$0xff]  ;;  %v204_v23 = vld [vmem:[%s715_s6 + $0x28] sm:$0xff]  ;;  %v203_v25 = vld [vmem:[%s715_s6 + $0x20] sm:$0xff]  ;;  %p588_p12 = pnand %p587_p11, %p701_p5 }
  0x1d   : > { %v302_v21 = vmul.f32 %v205_v19, %v205_v19  ;;  %v301_v24 = vmul.f32 %v204_v23, %v204_v23  ;;  %v300_v26 = vmul.f32 %v203_v25, %v203_v25  ;;  %v202_v27 = vld [vmem:[%s715_s6 + $0x18] sm:$0xff]  ;;  %v201_v29 = vld [vmem:[%s715_s6 + $0x10] sm:$0xff]  ;;  %v200_v31 = vld [vmem:[%s715_s6 + $0x8] sm:$0xff] }
  0x1e   : > { %477 = vmatpush.xpose.msk.msra.mxu0 %vm217_vm0, %v213_v2  ;;  %514 = vmatpush.xpose.msk.msra.mxu2 %vm217_vm0, %v213_v2  ;;  %v299_v28 = vmul.f32 %v202_v27, %v202_v27  ;;  %v298_v30 = vmul.f32 %v201_v29, %v201_v29  ;;  %v297_v32 = vmul.f32 %v200_v31, %v200_v31  ;;  %v199_v33 = vld [vmem:[%s715_s6] sm:$0xff]  ;;  %p589_p13 = pneg %p588_p12  ;;  %s590_s6 = scalar_lea.hbm %s829_s4, 2 }
  0x1f   : > { %v296_v34 = vmul.f32 %v199_v33, %v199_v33  ;;  %p592_p1 = scmp.lt.s32.totalorder %s590_s6, %s586_s30 }
  0x20   : > { %495 = vmatpush.xpose.msk.msra.mxu1 %vm217_vm0, %v310_v4 }
  0x21   : > { %p593_p2 = por %p592_p1, %p591_p0 }
  0x22   : > { %478 = vmatpush.xpose.msk.msra.mxu0 %vm217_vm0, %v212_v5  ;;  %515 = vmatpush.xpose.msk.msra.mxu2 %vm217_vm0, %v212_v5 }
  0x23   : > { %p594_p3 = pnand %p593_p2, %p589_p13 }
  0x24   : > { %496 = vmatpush.xpose.msk.msra.mxu1 %vm217_vm0, %v309_v6 }
  0x26   : > { %479 = vmatpush.xpose.msk.msra.mxu0 %vm217_vm0, %v211_v7  ;;  %516 = vmatpush.xpose.msk.msra.mxu2 %vm217_vm0, %v211_v7 }
  0x28   : > { %497 = vmatpush.xpose.msk.msra.mxu1 %vm217_vm0, %v308_v8 }
  0x2a   : > { %480 = vmatpush.xpose.msk.msra.mxu0 %vm217_vm0, %v210_v9  ;;  %517 = vmatpush.xpose.msk.msra.mxu2 %vm217_vm0, %v210_v9 }
  0x2c   : > { %498 = vmatpush.xpose.msk.msra.mxu1 %vm217_vm0, %v307_v10 }
  0x2e   : > { %481 = vmatpush.xpose.msk.msra.mxu0 %vm217_vm0, %v209_v11  ;;  %518 = vmatpush.xpose.msk.msra.mxu2 %vm217_vm0, %v209_v11 }
  0x30   : > { %499 = vmatpush.xpose.msk.msra.mxu1 %vm217_vm0, %v306_v12 }
  0x32   : > { %482 = vmatpush.xpose.msk.msra.mxu0 %vm217_vm0, %v208_v13  ;;  %519 = vmatpush.xpose.msk.msra.mxu2 %vm217_vm0, %v208_v13 }
  0x34   : > { %500 = vmatpush.xpose.msk.msra.mxu1 %vm217_vm0, %v305_v14 }
  0x36   : > { %483 = vmatpush.xpose.msk.msra.mxu0 %vm217_vm0, %v207_v15  ;;  %520 = vmatpush.xpose.msk.msra.mxu2 %vm217_vm0, %v207_v15 }
  0x38   : > { %501 = vmatpush.xpose.msk.msra.mxu1 %vm217_vm0, %v304_v16 }
  0x3a   : > { %484 = vmatpush.xpose.msk.msra.mxu0 %vm217_vm0, %v206_v17  ;;  %521 = vmatpush.xpose.msk.msra.mxu2 %vm217_vm0, %v206_v17 }
  0x3c   : > { %502 = vmatpush.xpose.msk.msra.mxu1 %vm217_vm0, %v303_v18 }
  0x3e   : > { %485 = vmatpush.xpose.msk.msra.mxu0 %vm217_vm0, %v205_v19  ;;  %522 = vmatpush.xpose.msk.msra.mxu2 %vm217_vm0, %v205_v19 }
  0x40   : > { %503 = vmatpush.xpose.msk.msra.mxu1 %vm217_vm0, %v302_v21 }
  0x42   : > { %486 = vmatpush.xpose.msk.msra.mxu0 %vm217_vm0, %v204_v23  ;;  %523 = vmatpush.xpose.msk.msra.mxu2 %vm217_vm0, %v204_v23 }
  0x44   : > { %504 = vmatpush.xpose.msk.msra.mxu1 %vm217_vm0, %v301_v24 }
  0x46   : > { %487 = vmatpush.xpose.msk.msra.mxu0 %vm217_vm0, %v203_v25  ;;  %524 = vmatpush.xpose.msk.msra.mxu2 %vm217_vm0, %v203_v25 }
  0x48   : > { %505 = vmatpush.xpose.msk.msra.mxu1 %vm217_vm0, %v300_v26 }
  0x4a   : > { %488 = vmatpush.xpose.msk.msra.mxu0 %vm217_vm0, %v202_v27  ;;  %525 = vmatpush.xpose.msk.msra.mxu2 %vm217_vm0, %v202_v27 }
  0x4c   : > { %506 = vmatpush.xpose.msk.msra.mxu1 %vm217_vm0, %v299_v28 }
  0x4e   : > { %489 = vmatpush.xpose.msk.msra.mxu0 %vm217_vm0, %v201_v29  ;;  %526 = vmatpush.xpose.msk.msra.mxu2 %vm217_vm0, %v201_v29 }
  0x50   : > { %507 = vmatpush.xpose.msk.msra.mxu1 %vm217_vm0, %v298_v30 }
  0x52   : > { %490 = vmatpush.xpose.msk.msra.mxu0 %vm217_vm0, %v200_v31  ;;  %527 = vmatpush.xpose.msk.msra.mxu2 %vm217_vm0, %v200_v31 }
  0x54   : > { %508 = vmatpush.xpose.msk.msra.mxu1 %vm217_vm0, %v297_v32 }
  0x56   : > { %491 = vmatpush.xpose.msk.msra.mxu0 %vm217_vm0, %v199_v33  ;;  %528 = vmatpush.xpose.msk.msra.mxu2 %vm217_vm0, %v199_v33 }
  0x58   : > { %509 = vmatpush.xpose.msk.msra.mxu1 %vm217_vm0, %v296_v34 }
  0x59   : > { %492 = vmatmul.msk.f32.vlgmr.msra.gmra.mxu0 %vm217_vm0, %v215_v35  ;;  %493 = vmatmul.msk.f32.vlgmr.msra.gmra.mxu2 %vm217_vm0, %v216_v36 }
  0x5b   : > { %510 = vmatmul.msk.f32.vlgmr.msra.gmra.mxu1 %vm217_vm0, %v295_v37 }
  0x8a   : > { %v387_v44 = vpop.permute.xlu0 %386 }
  0x8b   : > { %v389_v47 = vperm.slane %v387_v44, 0 }
  0xd6   : > { %v289_v38 = vpop.f32.mrf.mxu0 }
  0xd7   : > { %v391_v39 = vmul.f32 %v289_v38, %v289_v38 }
  0xd8   : > { %v380_v40 = vpop.f32.mrf.mxu1 }
  0xd9   : > { %v392_v41 = vsub.f32 %v391_v39, %v380_v40 }
  0xdb   : > { %v393_v42 = vrot.slane %v392_v41, 4 }
  0xdc   : > { %v292_v48 = vpop.f32.mrf.mxu2 }
  0xdd   : > { %v394_v43 = vadd.f32 %v393_v42, %v392_v41  ;;  %v390_v50 = vadd.f32 %v389_v47, %v292_v48 }
  0xdf   : > { %v395_v45 = vrot.slane %v394_v43, 2 }
  0xe1   : > { %v396_v46 = vadd.f32 %v395_v45, %v394_v43 }
  0xe3   : > { %v397_v49 = vrot.slane %v396_v46, 1 }
  0xe5   : > { %v398_v51 = vadd.f32 %v397_v49, %v396_v46 }
  0xe7   : > { %v399_v52 = vmul.f32 0.5, %v398_v51 }
  0xe9   : > { %v400_v53 = vadd.f32 %v399_v52, %v390_v50 }
  0xeb   : > { %401 = vst [vmem:[%s192_s21] sm:$0x1] %v400_v53 }
  0xec   : > { %597 = shalt.err (!%p594_p3)
}
  0xed   : > { %529 = dma.vmem_to_hbm [thread:$0]  (%p701_p5), %s414_s23, 16, %s416_s24, %s403_s28  }
  0xee PF: > { %p535_p4 = scmp.ge.s32.totalorder %s632_s20, 2  ;;  %s427_s9 = sand.u32 1, %s620_s17  }
  0xef   : > { %s428_s10 = scalar_lea.sflag [#allocation4], %s427_s9 }
  0xf0   : > { %p532_p7 = pnand %p535_p4, %p705_p6 }
  0xf2   : > { %p533_p8 = pneg %p532_p7 }
  0xf4   : > { %615 = dma.done.wait (%p533_p8), %s428_s10, 16  }
  0xf5   : > { %617 = vsyncadd (%p533_p8), %s428_s10, 4294967280  ;;  %p16_p9 = scmp.ge.s32.totalorder %s688_s22, 4   ;;  %s832_s17 = smov %s624_s18 }
  0xf6   : > { %s833_s18 = smov %s628_s19  ;;  %s834_s19 = smov %s699_s25 }
  0xf7   : > { %s835_s20 = smov %s688_s22  ;;  %18 = sbr.rel (!%p16_p9) target bundleno = 6 (0x6), region = 71 }
  0xfc   :  { %433 = vsyncpa [#allocation4], 1 }
  0xfd   :  { %435 = vsyncpa [#allocation4 + $0x1], 1 }

</bundles_post_ra>
